<compile_context>
chip_gen: v5e
topology: v5e:2x2
jax: 0.10.0
libtpu: 0.0.40
codegen_flags: <defaults>
</compile_context>

<pallas_src>
import functools

import jax
import jax.numpy as jnp
from jax.experimental import pallas as pl
from jax.experimental.pallas import tpu as pltpu


def _round_up(x, m):
    return ((x + m - 1) // m) * m


def _bce_dice_partials_kernel(x_ref, t_ref, out_ref, *, tile_l, tiles_per_split,
                              l_valid, needs_mask):
    """Accumulates per-sample partial sums for one (N, TILE_L) tile.

    out_ref block: (1, N, 128) f32, resident across the reduction axis.
      lane 0: sum(x*t)         (dice intersection)
      lane 1: sum(x*x)         (dice den1)
      lane 2: sum(t*t)         (dice den2)
      lane 3: sum(pos)         (num_pos contribution)
      lane 4: sum(neg)         (num_neg contribution)
      lane 5: sum(pos * elem)  (S_pos, weighted-BCE partial)
      lane 6: sum(neg * elem)  (S_neg, weighted-BCE partial)
    """
    s = pl.program_id(0)          # parallel split index
    k = pl.program_id(1)          # reduction-tile index within the split

    @pl.when(k == 0)
    def _init():
        out_ref[...] = jnp.zeros_like(out_ref)

    # Native-dtype tiles streamed from HBM; cast to f32 in-register.
    x = x_ref[...].astype(jnp.float32)     # (N, TILE_L)
    t = t_ref[...].astype(jnp.float32)
    n = x.shape[0]

    pos = (t == 1.0).astype(jnp.float32)
    neg = (t == 0.0).astype(jnp.float32)
    if needs_mask:
        # Mask lanes past the real L. x/t are zero-padded, so inter/den1/den2
        # are already correct; only pos/neg (hence counts and S_pos/S_neg)
        # need explicit masking (x=0,t=0 gives neg=1 and elem=log 2).
        base = (s * tiles_per_split + k) * tile_l
        col = base + jax.lax.broadcasted_iota(jnp.int32, x.shape, 1)
        valid = col < l_valid
        pos = jnp.where(valid, pos, 0.0)
        neg = jnp.where(valid, neg, 0.0)

    xt = x * t                                   # reused for inter and elem
    # numerically stable elementwise BCE-with-logits
    elem = jnp.maximum(x, 0.0) - xt + jnp.log1p(jnp.exp(-jnp.abs(x)))

    inter = jnp.sum(xt, axis=1, keepdims=True)          # (N, 1)
    den1 = jnp.sum(x * x, axis=1, keepdims=True)
    den2 = jnp.sum(t * t, axis=1, keepdims=True)
    npos = jnp.sum(pos, axis=1, keepdims=True)
    nneg = jnp.sum(neg, axis=1, keepdims=True)
    spos = jnp.sum(pos * elem, axis=1, keepdims=True)
    sneg = jnp.sum(neg * elem, axis=1, keepdims=True)

    # Scatter the 7 per-sample partials into distinct lanes of a (N, 128) slab.
    lane = jax.lax.broadcasted_iota(jnp.int32, (n, 128), 1)
    update = (jnp.where(lane == 0, inter, 0.0)
              + jnp.where(lane == 1, den1, 0.0)
              + jnp.where(lane == 2, den2, 0.0)
              + jnp.where(lane == 3, npos, 0.0)
              + jnp.where(lane == 4, nneg, 0.0)
              + jnp.where(lane == 5, spos, 0.0)
              + jnp.where(lane == 6, sneg, 0.0))
    out_ref[...] += update[None, :, :]


def bce_dice_loss(logits, target, *, tile_l=2048, num_splits=2):
    """logits, target: (N, C, H, W); C expected to be 1 (as in the PyTorch module)."""
    n, c, h, w = logits.shape
    l = c * h * w

    # Tile sizing: lane tiles of up to `tile_l` (multiple of 128), split across
    # `num_splits` independent streams (megacore-parallel on v7x).
    tile_l = min(tile_l, _round_up(-(-l // num_splits), 128))
    tiles_per_split = -(-l // (num_splits * tile_l))
    l_pad = num_splits * tiles_per_split * tile_l

    x2d = logits.reshape(n, l)        # keep native dtype; cast per-tile in kernel
    t2d = target.reshape(n, l)
    if l_pad != l:
        x2d = jnp.pad(x2d, ((0, 0), (0, l_pad - l)))
        t2d = jnp.pad(t2d, ((0, 0), (0, l_pad - l)))

    kernel = functools.partial(
        _bce_dice_partials_kernel,
        tile_l=tile_l, tiles_per_split=tiles_per_split,
        l_valid=l, needs_mask=(l_pad != l))

    parts = pl.pallas_call(
        kernel,
        out_shape=jax.ShapeDtypeStruct((num_splits, n, 128), jnp.float32),
        grid=(num_splits, tiles_per_split),
        in_specs=[
            pl.BlockSpec((n, tile_l), lambda s, k: (0, s * tiles_per_split + k)),
            pl.BlockSpec((n, tile_l), lambda s, k: (0, s * tiles_per_split + k)),
        ],
        out_specs=pl.BlockSpec((1, n, 128), lambda s, k: (s, 0, 0)),
        compiler_params=pltpu.CompilerParams(
            dimension_semantics=("parallel", "arbitrary")),
    )(x2d, t2d)

    # ---- tiny finalize in plain JAX ----
    p = jnp.sum(parts, axis=0)                   # (N, 128): combine the splits
    inter, den1, den2 = p[:, 0], p[:, 1], p[:, 2]
    num_pos = jnp.sum(p[:, 3])
    num_neg = jnp.sum(p[:, 4])
    s_pos = jnp.sum(p[:, 5])
    s_neg = jnp.sum(p[:, 6])

    eps = 1e-8
    dice = 2.0 * (inter + eps) / (den1 + den2 + eps)
    dc_loss = 1.0 - jnp.sum(dice) / n

    num_total = num_pos + num_neg
    alpha = num_neg / num_total
    beta = 1.1 * num_pos / num_total
    # sum(weights*elem) == alpha*S_pos + beta*S_neg ; mean over original numel.
    ce_loss = (alpha * s_pos + beta * s_neg) / (n * l)
    return ce_loss + dc_loss


def _reference(logits, target):
    # Pure-JAX mirror of the PyTorch module (C == 1 case) for sanity checking.
    x = logits.astype(jnp.float32)
    t = target.astype(jnp.float32)
    n = x.shape[0]
    probs = jnp.squeeze(x, 1)
    mask = jnp.squeeze(t, 1)
    inter = jnp.sum(probs * mask, axis=(1, 2))
    den1 = jnp.sum(probs * probs, axis=(1, 2))
    den2 = jnp.sum(mask * mask, axis=(1, 2))
    eps = 1e-8
    dice = 2.0 * (inter + eps) / (den1 + den2 + eps)
    dc = 1.0 - jnp.sum(dice) / n

    pos = (t == 1.0).astype(jnp.float32)
    neg = (t == 0.0).astype(jnp.float32)
    num_pos = jnp.sum(pos)
    num_neg = jnp.sum(neg)
    alpha = num_neg / (num_pos + num_neg)
    beta = 1.1 * num_pos / (num_pos + num_neg)
    weights = alpha * pos + beta * neg
    elem = jnp.maximum(x, 0.0) - x * t + jnp.log1p(jnp.exp(-jnp.abs(x)))
    ce = jnp.sum(weights * elem) / x.size
    return ce + dc


if __name__ == "__main__":
    key = jax.random.PRNGKey(0)
    k1, k2, k3, k4 = jax.random.split(key, 4)

    # Case 1: aligned spatial size (no padding path), f32 inputs.
    logits = jax.random.normal(k1, (2, 1, 16, 16), dtype=jnp.float32)
    target = jax.random.bernoulli(k2, 0.4, (2, 1, 16, 16)).astype(jnp.float32)
    loss = jax.block_until_ready(bce_dice_loss(logits, target))
    ref = jax.block_until_ready(_reference(logits, target))
    assert jnp.allclose(loss, ref, rtol=1e-5, atol=1e-5), (loss, ref)

    # Case 2: L not a multiple of the tile (exercises padding + in-kernel mask)
    #         with bf16 logits (exercises the native-dtype streaming path).
    logits2 = jax.random.normal(k3, (2, 1, 16, 20), dtype=jnp.float32).astype(jnp.bfloat16)
    target2 = jax.random.bernoulli(k4, 0.4, (2, 1, 16, 20)).astype(jnp.float32)
    loss2 = jax.block_until_ready(bce_dice_loss(logits2, target2))
    ref2 = jax.block_until_ready(_reference(logits2.astype(jnp.float32), target2))
    assert jnp.allclose(loss2, ref2, rtol=1e-4, atol=1e-4), (loss2, ref2)

    print("KERNEL_OK")
</pallas_src>

<mosaic_0001>
module attributes {stable_mosaic.version = 11 : i64} {
  func.func @_bce_dice_partials_kernel(%arg0: i32, %arg1: i32, %arg2: memref<2x128xf32, #tpu.memory_space<vmem>>, %arg3: memref<2x128xf32, #tpu.memory_space<vmem>>, %arg4: memref<1x2x128xf32, #tpu.memory_space<vmem>>) attributes {dimension_semantics = [#tpu.dimension_semantics<parallel>, #tpu.dimension_semantics<arbitrary>], iteration_bounds = array<i64: 2, 1>, scalar_prefetch = 0 : i64, scratch_operands = 0 : i64, tpu.core_type = #tpu.core_type<tc>, window_params = [{transform_indices = @transform_0, window_bounds = array<i64: 2, 128>}, {transform_indices = @transform_1, window_bounds = array<i64: 2, 128>}, {transform_indices = @transform_2, window_bounds = array<i64: 1, 2, 128>}]} {
    %c0_i32 = arith.constant 0 : i32
    %0 = arith.cmpi eq, %arg1, %c0_i32 : i32
    %1 = arith.extui %0 : i1 to i32
    %c0_i32_0 = arith.constant 0 : i32
    %2 = arith.cmpi ne, %1, %c0_i32_0 : i32
    scf.if %2 {
      %cst_28 = arith.constant 0.000000e+00 : f32
      %94 = vector.broadcast %cst_28 : f32 to vector<1x2x128xf32>
      %c0_29 = arith.constant 0 : index
      %c0_30 = arith.constant 0 : index
      %c0_31 = arith.constant 0 : index
      %95 = vector.load %arg4[%c0_29, %c0_30, %c0_31] : memref<1x2x128xf32, #tpu.memory_space<vmem>>, vector<1x2x128xf32>
      tpu.vector_store %arg4[%c0_29, %c0_30, %c0_31], %94 {strides = array<i32>} : memref<1x2x128xf32, #tpu.memory_space<vmem>>, vector<1x2x128xf32>,
    } else {
    }
    %c0 = arith.constant 0 : index
    %c0_1 = arith.constant 0 : index
    %3 = vector.load %arg2[%c0, %c0_1] : memref<2x128xf32, #tpu.memory_space<vmem>>, vector<2x128xf32>
    %c0_2 = arith.constant 0 : index
    %c0_3 = arith.constant 0 : index
    %4 = vector.load %arg3[%c0_2, %c0_3] : memref<2x128xf32, #tpu.memory_space<vmem>>, vector<2x128xf32>
    %cst = arith.constant 1.000000e+00 : f32
    %5 = vector.broadcast %cst : f32 to vector<2x128xf32>
    %6 = arith.cmpf oeq, %4, %5 : vector<2x128xf32>
    %7 = arith.extui %6 : vector<2x128xi1> to vector<2x128xi32>
    %8 = arith.sitofp %7 : vector<2x128xi32> to vector<2x128xf32>
    %cst_4 = arith.constant 0.000000e+00 : f32
    %9 = vector.broadcast %cst_4 : f32 to vector<2x128xf32>
    %10 = arith.cmpf oeq, %4, %9 : vector<2x128xf32>
    %11 = arith.extui %10 : vector<2x128xi1> to vector<2x128xi32>
    %12 = arith.sitofp %11 : vector<2x128xi32> to vector<2x128xf32>
    %13 = arith.mulf %3, %4 : vector<2x128xf32>
    %cst_5 = arith.constant 0.000000e+00 : f32
    %14 = vector.broadcast %cst_5 : f32 to vector<2x128xf32>
    %15 = arith.maximumf %3, %14 : vector<2x128xf32>
    %16 = arith.subf %15, %13 : vector<2x128xf32>
    %17 = math.absf %3 : vector<2x128xf32>
    %cst_6 = arith.constant 0.000000e+00 : f32
    %18 = vector.broadcast %cst_6 : f32 to vector<2x128xf32>
    %19 = arith.subf %18, %17 : vector<2x128xf32>
    %20 = math.exp %19 : vector<2x128xf32>
    %21 = math.log1p %20 : vector<2x128xf32>
    %22 = arith.addf %16, %21 : vector<2x128xf32>
    %cst_7 = arith.constant dense<0.000000e+00> : vector<2xf32>
    %23 = vector.multi_reduction <add>, %13, %cst_7 [1] : vector<2x128xf32> to vector<2xf32>
    %24 = vector.shape_cast %23 : vector<2xf32> to vector<2x1xf32>
    %25 = arith.mulf %3, %3 : vector<2x128xf32>
    %cst_8 = arith.constant dense<0.000000e+00> : vector<2xf32>
    %26 = vector.multi_reduction <add>, %25, %cst_8 [1] : vector<2x128xf32> to vector<2xf32>
    %27 = vector.shape_cast %26 : vector<2xf32> to vector<2x1xf32>
    %28 = arith.mulf %4, %4 : vector<2x128xf32>
    %cst_9 = arith.constant dense<0.000000e+00> : vector<2xf32>
    %29 = vector.multi_reduction <add>, %28, %cst_9 [1] : vector<2x128xf32> to vector<2xf32>
    %30 = vector.shape_cast %29 : vector<2xf32> to vector<2x1xf32>
    %cst_10 = arith.constant dense<0.000000e+00> : vector<2xf32>
    %31 = vector.multi_reduction <add>, %8, %cst_10 [1] : vector<2x128xf32> to vector<2xf32>
    %32 = vector.shape_cast %31 : vector<2xf32> to vector<2x1xf32>
    %cst_11 = arith.constant dense<0.000000e+00> : vector<2xf32>
    %33 = vector.multi_reduction <add>, %12, %cst_11 [1] : vector<2x128xf32> to vector<2xf32>
    %34 = vector.shape_cast %33 : vector<2xf32> to vector<2x1xf32>
    %35 = arith.mulf %8, %22 : vector<2x128xf32>
    %cst_12 = arith.constant dense<0.000000e+00> : vector<2xf32>
    %36 = vector.multi_reduction <add>, %35, %cst_12 [1] : vector<2x128xf32> to vector<2xf32>
    %37 = vector.shape_cast %36 : vector<2xf32> to vector<2x1xf32>
    %38 = arith.mulf %12, %22 : vector<2x128xf32>
    %cst_13 = arith.constant dense<0.000000e+00> : vector<2xf32>
    %39 = vector.multi_reduction <add>, %38, %cst_13 [1] : vector<2x128xf32> to vector<2xf32>
    %40 = vector.shape_cast %39 : vector<2xf32> to vector<2x1xf32>
    %41 = tpu.iota {dimensions = array<i32: 1>} : vector<2x128xi32>
    %c0_i32_14 = arith.constant 0 : i32
    %42 = vector.broadcast %c0_i32_14 : i32 to vector<2x128xi32>
    %43 = arith.cmpi eq, %41, %42 : vector<2x128xi32>
    %cst_15 = arith.constant 0.000000e+00 : f32
    %44 = vector.shape_cast %24 : vector<2x1xf32> to vector<2x1xf32>
    %45 = vector.broadcast %44 : vector<2x1xf32> to vector<2x128xf32>
    %46 = vector.broadcast %cst_15 : f32 to vector<2x128xf32>
    %47 = arith.select %43, %45, %46 : vector<2x128xi1>, vector<2x128xf32>
    %c1_i32 = arith.constant 1 : i32
    %48 = vector.broadcast %c1_i32 : i32 to vector<2x128xi32>
    %49 = arith.cmpi eq, %41, %48 : vector<2x128xi32>
    %cst_16 = arith.constant 0.000000e+00 : f32
    %50 = vector.shape_cast %27 : vector<2x1xf32> to vector<2x1xf32>
    %51 = vector.broadcast %50 : vector<2x1xf32> to vector<2x128xf32>
    %52 = vector.broadcast %cst_16 : f32 to vector<2x128xf32>
    %53 = arith.select %49, %51, %52 : vector<2x128xi1>, vector<2x128xf32>
    %54 = arith.addf %47, %53 : vector<2x128xf32>
    %c2_i32 = arith.constant 2 : i32
    %55 = vector.broadcast %c2_i32 : i32 to vector<2x128xi32>
    %56 = arith.cmpi eq, %41, %55 : vector<2x128xi32>
    %cst_17 = arith.constant 0.000000e+00 : f32
    %57 = vector.shape_cast %30 : vector<2x1xf32> to vector<2x1xf32>
    %58 = vector.broadcast %57 : vector<2x1xf32> to vector<2x128xf32>
    %59 = vector.broadcast %cst_17 : f32 to vector<2x128xf32>
    %60 = arith.select %56, %58, %59 : vector<2x128xi1>, vector<2x128xf32>
    %61 = arith.addf %54, %60 : vector<2x128xf32>
    %c3_i32 = arith.constant 3 : i32
    %62 = vector.broadcast %c3_i32 : i32 to vector<2x128xi32>
    %63 = arith.cmpi eq, %41, %62 : vector<2x128xi32>
    %cst_18 = arith.constant 0.000000e+00 : f32
    %64 = vector.shape_cast %32 : vector<2x1xf32> to vector<2x1xf32>
    %65 = vector.broadcast %64 : vector<2x1xf32> to vector<2x128xf32>
    %66 = vector.broadcast %cst_18 : f32 to vector<2x128xf32>
    %67 = arith.select %63, %65, %66 : vector<2x128xi1>, vector<2x128xf32>
    %68 = arith.addf %61, %67 : vector<2x128xf32>
    %c4_i32 = arith.constant 4 : i32
    %69 = vector.broadcast %c4_i32 : i32 to vector<2x128xi32>
    %70 = arith.cmpi eq, %41, %69 : vector<2x128xi32>
    %cst_19 = arith.constant 0.000000e+00 : f32
    %71 = vector.shape_cast %34 : vector<2x1xf32> to vector<2x1xf32>
    %72 = vector.broadcast %71 : vector<2x1xf32> to vector<2x128xf32>
    %73 = vector.broadcast %cst_19 : f32 to vector<2x128xf32>
    %74 = arith.select %70, %72, %73 : vector<2x128xi1>, vector<2x128xf32>
    %75 = arith.addf %68, %74 : vector<2x128xf32>
    %c5_i32 = arith.constant 5 : i32
    %76 = vector.broadcast %c5_i32 : i32 to vector<2x128xi32>
    %77 = arith.cmpi eq, %41, %76 : vector<2x128xi32>
    %cst_20 = arith.constant 0.000000e+00 : f32
    %78 = vector.shape_cast %37 : vector<2x1xf32> to vector<2x1xf32>
    %79 = vector.broadcast %78 : vector<2x1xf32> to vector<2x128xf32>
    %80 = vector.broadcast %cst_20 : f32 to vector<2x128xf32>
    %81 = arith.select %77, %79, %80 : vector<2x128xi1>, vector<2x128xf32>
    %82 = arith.addf %75, %81 : vector<2x128xf32>
    %c6_i32 = arith.constant 6 : i32
    %83 = vector.broadcast %c6_i32 : i32 to vector<2x128xi32>
    %84 = arith.cmpi eq, %41, %83 : vector<2x128xi32>
    %cst_21 = arith.constant 0.000000e+00 : f32
    %85 = vector.shape_cast %40 : vector<2x1xf32> to vector<2x1xf32>
    %86 = vector.broadcast %85 : vector<2x1xf32> to vector<2x128xf32>
    %87 = vector.broadcast %cst_21 : f32 to vector<2x128xf32>
    %88 = arith.select %84, %86, %87 : vector<2x128xi1>, vector<2x128xf32>
    %89 = arith.addf %82, %88 : vector<2x128xf32>
    %c0_22 = arith.constant 0 : index
    %c0_23 = arith.constant 0 : index
    %c0_24 = arith.constant 0 : index
    %90 = vector.load %arg4[%c0_22, %c0_23, %c0_24] : memref<1x2x128xf32, #tpu.memory_space<vmem>>, vector<1x2x128xf32>
    %91 = vector.shape_cast %89 : vector<2x128xf32> to vector<1x2x128xf32>
    %92 = arith.addf %90, %91 : vector<1x2x128xf32>
    %c0_25 = arith.constant 0 : index
    %c0_26 = arith.constant 0 : index
    %c0_27 = arith.constant 0 : index
    %93 = vector.load %arg4[%c0_25, %c0_26, %c0_27] : memref<1x2x128xf32, #tpu.memory_space<vmem>>, vector<1x2x128xf32>
    tpu.vector_store %arg4[%c0_25, %c0_26, %c0_27], %92 {strides = array<i32>} : memref<1x2x128xf32, #tpu.memory_space<vmem>>, vector<1x2x128xf32>,
    return
  }
  func.func @transform_0(%arg0: i32, %arg1: i32) -> (i32, i32) {
    %c1_i32 = arith.constant 1 : i32
    %0 = arith.muli %arg0, %c1_i32 : i32
    %1 = arith.addi %0, %arg1 : i32
    %c0_i32 = arith.constant 0 : i32
    %c0_i32_0 = arith.constant 0 : i32
    return %c0_i32, %1 : i32, i32
  }
  func.func @transform_1(%arg0: i32, %arg1: i32) -> (i32, i32) {
    %c1_i32 = arith.constant 1 : i32
    %0 = arith.muli %arg0, %c1_i32 : i32
    %1 = arith.addi %0, %arg1 : i32
    %c0_i32 = arith.constant 0 : i32
    %c0_i32_0 = arith.constant 0 : i32
    return %c0_i32, %1 : i32, i32
  }
  func.func @transform_2(%arg0: i32, %arg1: i32) -> (i32, i32, i32) {
    %c0_i32 = arith.constant 0 : i32
    %c0_i32_0 = arith.constant 0 : i32
    %c0_i32_1 = arith.constant 0 : i32
    return %arg0, %c0_i32, %c0_i32_0 : i32, i32, i32
  }
}

</mosaic_0001>

<bundles_post_ra>
// kernel: tpu_custom_call.1
= control target key start
LH: loop header
LB: loop body
LE: loop exit
PB: predicated region body
PF: predicated region fallthrough
CT: control target
= control target key end

     0   :  { %7 = vsyncpa [#allocation3], 0  ;;  %s815_s0 = inlined_call_operand.hbm [shape: f32[2,256], index: 0, kind: input, shape index: {}]   ;;  %s816_s1 = inlined_call_operand.hbm [shape: f32[2,256], index: 1, kind: input, shape index: {}]   ;;  %s817_s2 = inlined_call_operand.hbm [shape: f32[2,2,128], index: 2, kind: output, shape index: {}]  }
   0x1   :  { %9 = vsyncpa [#allocation3 + $0x1], 0 }
   0x2   :  { %10 = vsyncpa [#allocation6], 0 }
   0x3   :  { %12 = vsyncpa [#allocation6 + $0x1], 0 }
   0x4   :  { %13 = vsyncpa [#allocation4], 0 }
   0x5   :  { %15 = vsyncpa [#allocation4 + $0x1], 0  ;;  %s674_s9 = smov 0   ;;  %s676_s10 = smov 0  }
   0x6   :  { %s678_s11 = smov 0   ;;  %s680_s12 = smov 0  }
   0x7   :  { %s682_s13 = smov 0   ;;  %s684_s14 = smov 0  }
   0x8 LB: > { %s420_s15 = sadd.s32 4294967295, %s656_s14   ;;  %s421_s16 = sadd.s32 4294967294, %s656_s14   ;;  %s656_s14 = sphi %s684_s14, %s21_s14   ;;  %s652_s13 = sphi %s682_s13, %s826_s13   ;;  %s648_s12 = sphi %s680_s12, %s825_s12   ;;  %s644_s11 = sphi %s678_s11, %s824_s11   ;;  %s640_s10 = sphi %s676_s10, %s823_s10   ;;  %s636_s9 = sphi %s674_s9, %s822_s9  }
   0x9   : > { %s33_s17 = sadd.s32 1, %s652_s13  ;;  %s42_s18 = sadd.s32 1, %s644_s11 }
   0xa   : > { %p35_p0 = scmp.ge.s32.totalorder %s33_s17, 2  ;;  %p49_p1 = scmp.ne.s32.totalorder %s644_s11, %s640_s10 }
   0xb   : > { %p50_p2 = scmp.eq.s32.totalorder %s656_s14, 0  ;;  %p55_p3 = scmp.ne.s32.totalorder %s640_s10, %s636_s9 }
   0xc   : > { %s828_s17 = smov (%p35_p0, %s33_s17), 0  ;;  %p56_p5 = scmp.eq.s32.totalorder %s420_s15, 0 }
   0xd   : > { %p715_p4 = por %p50_p2, %p49_p1  ;;  %s39_s20 = ssub.s32 %s652_s13, %s828_s17 }
   0xe   : > { %p107_p6 = scmp.eq.s32.totalorder %s420_s15, 1  ;;  %p40_p7 = scmp.eq.s32.totalorder %s39_s20, 0 }
   0xf   : > { %p721_p8 = por %p56_p5, %p55_p3  ;;  %p113_p10 = scmp.eq.s32.totalorder %s421_s16, 1 }
  0x10   : > { %p725_p9 = por %p107_p6, %p49_p1  ;;  %p423_p12 = scmp.ge.s32.totalorder %s656_s14, 2 }
  0x11   : > { %s730_s23 = scalar_select %p40_p7, %s644_s11, %s42_s18  }
  0x12   : > { %p732_p11 = por %p113_p10, %p55_p3  ;;  %p455_p13 = scmp.lt.s32.totalorder %s656_s14, 2 }
  0x13   : > { %s133_s25 = sand.u32 1, %s644_s11   ;;  %s425_s27 = sshll.u32 %s652_s13, 1 }
  0x14   : > { %s424_s26 = sshll.u32 %s133_s25, 1  ;;  %s142_s30 = scalar_lea.hbm %s815_s0, %s425_s27 }
  0x15   : > { %s137_s3 = scalar_lea.vmem [#allocation2], %s424_s26  ;;  %s144_s5 = sshll.u32 %s142_s30, 4  ;;  %s145_s5 = int_to_ptr.hbm [resolvable:$true] %s144_s5 }
  0x16   : > { %s146_s4 = sshll.u32 %s137_s3, 4  ;;  %p445_p0 = pnand %p455_p13, %p715_p4  ;;  %s147_s4 = int_to_ptr.vmem [resolvable:$true] %s146_s4 }
  0x17   : > { %p428_p1 = scmp.ge.s32.totalorder %s656_s14, 1  ;;  %p171_p2 = scmp.lt.s32.totalorder %s656_s14, 3 }
  0x18   : > { %s134_s6 = scalar_lea.sflag [#allocation3], %s133_s25  ;;  %s162_s15 = scalar_lea.hbm %s816_s1, %s425_s27 }
  0x19   : > { %447 = dma.hbm_to_vmem [thread:$0]  (!%p445_p0), %s145_s5, 32, %s147_s4, %s134_s6  }
  0x1a   : > { %p172_p3 = pnand %p428_p1, %p171_p2  ;;  %s157_s16 = scalar_lea.vmem [#allocation5], %s424_s26 }
  0x1b   : > { %s166_s18 = sshll.u32 %s157_s16, 4  ;;  %s164_s20 = sshll.u32 %s162_s15, 4  ;;  %s167_s18 = int_to_ptr.vmem [resolvable:$true] %s166_s18  ;;  %s165_s20 = int_to_ptr.hbm [resolvable:$true] %s164_s20 }
  0x1c   : > { %s154_s28 = scalar_lea.sflag [#allocation6], %s133_s25  ;;  %175 = sbr.rel (%p172_p3) target bundleno = 193 (0xc1), region = 28 }
  0x1d   : > { %450 = dma.hbm_to_vmem [thread:$0]  (!%p445_p0), %s165_s20, 32, %s167_s18, %s154_s28  }
  0x1e   : > { %s751_s19 = sand.u32 (!%p172_p3), 1, %s640_s10  }
  0x1f   : > { %s429_s29 = sshll.u32 (!%p172_p3), %s751_s19, 1  ;;  %s178_s30 = scalar_lea.sflag (!%p172_p3), [#allocation3], %s751_s19 }
  0x20   : > { %s181_s3 = scalar_lea.vmem (!%p172_p3), [#allocation2], %s429_s29 }
  0x21   : > { %623 = dma.done.wait (%p721_p8), %s178_s30, 32  }
  0x22   : > { %625 = vsyncadd (%p721_p8), %s178_s30, 4294967264  ;;  %s188_s26 = scalar_lea.sflag [#allocation6], %s751_s19  ;;  %s191_s25 = scalar_lea.vmem [#allocation5], %s429_s29 }
  0x23   : > { %627 = dma.done.wait (%p721_p8), %s188_s26, 32  }
  0x24   : > { %629 = vsyncadd (%p721_p8), %s188_s26, 4294967264  ;;  %s764_s27 = scalar_lea.vmem [#allocation7], %s429_s29  ;;  %v658_v0 = vmov 0.0   ;;  %v225_v1 = vld [vmem:[%s181_s3] sm:$0x3]  ;;  %vm250_vm0 = vcmask 1041408   ;;  %v276_v33 = vlaneseq }
  0x25   : > { %224 = vst [vmem:[%s764_s27] sm:$0x3] %v658_v0  ;;  %v226_v2 = vld [vmem:[%s191_s25] sm:$0x3]  ;;  %v236_v4 = vand.u32 2147483647, %v225_v1  ;;  %v254_v11 = vmul.f32 %v225_v1, %v225_v1  ;;  %v234_v20 = vmax.f32 %v225_v1, 0.0 }
  0x26   : > { %v233_v3 = vmul.f32 %v226_v2, %v225_v1  ;;  %v258_v5 = vmul.f32 %v226_v2, %v226_v2  ;;  %vm230_vm1 = vcmp.eq.f32.partialorder %v226_v2, 0.0  ;;  %vm227_vm2 = vcmp.eq.f32.partialorder %v226_v2, 1.0  ;;  %s435_s21 = sshll.u32 %s648_s12, 1  ;;  %s314_s7 = sshll.u32 %s764_s27, 4  ;;  %s315_s7 = int_to_ptr.vmem [resolvable:$true] %s314_s7 }
  0x27   : > { %v237_v6 = vsub.f32 0.0, %v236_v4  ;;  %v433_v9 = vsel %vm230_vm1, 1.0, %v658_v0  ;;  %v432_v13 = vsel %vm227_vm2, 1.0, %v658_v0  ;;  %v255_v14 = vsel %vm250_vm0, %v254_v11, 0.0  ;;  %s312_s6 = scalar_lea.hbm %s817_s2, %s435_s21  ;;  %s302_s12 = scalar_lea.sflag [#allocation4], %s751_s19 }
  0x28   : > { %v251_v7 = vsel %vm250_vm0, %v233_v3, 0.0  ;;  %v259_v8 = vsel %vm250_vm0, %v258_v5, 0.0  ;;  %v265_v12 = vsel %vm250_vm0, %v433_v9, 0.0  ;;  %v262_v15 = vsel %vm250_vm0, %v432_v13, 0.0  ;;  %s316_s8 = sshll.u32 %s312_s6, 4  ;;  %s590_s28 = scalar_lea.hbm %s817_s2, 4  ;;  %s317_s8 = int_to_ptr.hbm [resolvable:$true] %s316_s8 }
  0x29   : > { %252 = vadd.xlane.f32.xlu0 %v251_v7  ;;  %260 = vadd.xlane.f32.xlu1 %v259_v8  ;;  %v238_v10 = vmul.f32 1.442695, %v237_v6  ;;  %v235_v24 = vsub.f32 %v234_v20, %v233_v3  ;;  %v277_v34 = vand.u32 127, %v276_v33  ;;  %s584_s15 = sshra.s32 %s317_s8, 4  ;;  %s585_s15 = int_to_ptr.hbm [resolvable:$true] %s584_s15 }
  0x2a   : > { %266 = vadd.xlane.f32.xlu2 %v265_v12  ;;  %s586_s16 = scalar_lea.hbm %s585_s15, 2  ;;  %p591_p7 = scmp.lt.s32.totalorder %s585_s15, %s817_s2 }
  0x2b   : > { %506 = vpow2.f32 %v238_v10  ;;  %vm278_vm4 = vcmp.eq.s32.totalorder %v277_v34, 0  ;;  %vm280_vm5 = vcmp.eq.s32.totalorder %v277_v34, 1  ;;  %vm283_vm6 = vcmp.eq.s32.totalorder %v277_v34, 2  ;;  %p587_p4 = scmp.ne.s32.totalorder %s585_s15, %s586_s16  ;;  %p592_p8 = scmp.lt.s32.totalorder %s590_s28, %s586_s16 }
  0x2c   : > { %vm286_vm7 = vcmp.eq.s32.totalorder %v277_v34, 3  ;;  %vm289_vm8 = vcmp.eq.s32.totalorder %v277_v34, 4  ;;  %vm292_vm9 = vcmp.eq.s32.totalorder %v277_v34, 5  ;;  %vm295_vm10 = vcmp.eq.s32.totalorder %v277_v34, 6  ;;  %v298_v53 = vld [vmem:[%s764_s27] sm:$0x3] }
  0x2d   : > { %p588_p5 = pnand %p587_p4, %p725_p9  ;;  %p593_p10 = por %p592_p8, %p591_p7 }
  0x2f   : > { %p589_p6 = pneg %p588_p5 }
  0x31   : > { %256 = vadd.xlane.f32.xlu0 %v255_v14  ;;  %263 = vadd.xlane.f32.xlu1 %v262_v15  ;;  %v507_v16 = vpop.eup %506  ;;  %p594_p13 = pnand %p593_p10, %p589_p6 }
  0x32   : > { %v240_v17 = vadd.f32 1.0, %v507_v16  ;;  %v243_v18 = vmul.f32 -0.5, %v507_v16  ;;  %v246_v21 = vand.u32 2147483647, %v507_v16 }
  0x34   : > { %508 = vlog2.f32 %v240_v17  ;;  %v244_v19 = vadd.f32 1.0, %v243_v18  ;;  %vm247_vm3 = vcmp.lt.f32.partialorder %v246_v21, 0.0004427343 }
  0x36   : > { %v245_v22 = vmul.f32 %v507_v16, %v244_v19 }
  0x3a   : > { %v509_v23 = vpop.eup %508 }
  0x3b   : > { %v242_v25 = vmul.f32 0.6931472, %v509_v23 }
  0x3d   : > { %v248_v26 = vsel %vm247_vm3, %v245_v22, %v242_v25 }
  0x3e   : > { %v249_v27 = vadd.f32 %v248_v26, %v235_v24 }
  0x40   : > { %v272_v28 = vmul.f32 %v433_v9, %v249_v27  ;;  %v268_v29 = vmul.f32 %v432_v13, %v249_v27 }
  0x42   : > { %v269_v30 = vsel %vm250_vm0, %v268_v29, 0.0  ;;  %v273_v31 = vsel %vm250_vm0, %v272_v28, 0.0 }
  0x43   : > { %270 = vadd.xlane.f32.xlu2 %v269_v30  ;;  %274 = vadd.xlane.f32.xlu0 %v273_v31 }
  0x9c   : > { %v253_v32 = vpop.xlane.xlu0 %252  ;;  %v261_v35 = vpop.xlane.xlu1 %260 }
  0x9d   : > { %v279_v37 = vsel %vm278_vm4, %v253_v32, 0.0  ;;  %v284_v40 = vsel %vm283_vm6, %v261_v35, 0.0  ;;  %v267_v43 = vpop.xlane.xlu2 %266 }
  0x9e   : > { %v290_v46 = vsel %vm289_vm8, %v267_v43, 0.0 }
  0xa4   : > { %v257_v36 = vpop.xlane.xlu0 %256  ;;  %v264_v41 = vpop.xlane.xlu1 %263 }
  0xa5   : > { %v281_v38 = vsel %vm280_vm5, %v257_v36, 0.0  ;;  %v287_v44 = vsel %vm286_vm7, %v264_v41, 0.0 }
  0xa6   : > { %v282_v39 = vadd.f32 %v281_v38, %v279_v37 }
  0xa8   : > { %v285_v42 = vadd.f32 %v284_v40, %v282_v39 }
  0xaa   : > { %v288_v45 = vadd.f32 %v287_v44, %v285_v42 }
  0xac   : > { %v291_v47 = vadd.f32 %v290_v46, %v288_v45 }
  0xb6   : > { %v271_v48 = vpop.xlane.xlu2 %270  ;;  %v275_v49 = vpop.xlane.xlu0 %274 }
  0xb7   : > { %v293_v50 = vsel %vm292_vm9, %v271_v48, 0.0  ;;  %v296_v51 = vsel %vm295_vm10, %v275_v49, 0.0 }
  0xb8   : > { %v294_v52 = vadd.f32 %v293_v50, %v291_v47 }
  0xba   : > { %v297_v54 = vadd.f32 %v296_v51, %v294_v52 }
  0xbc   : > { %v299_v55 = vadd.f32 %v298_v53, %v297_v54 }
  0xbe   : > { %300 = vst [vmem:[%s764_s27] sm:$0x3] %v299_v55 }
  0xbf   : > { %597 = shalt.err (!%p594_p13)
}
  0xc0   : > { %442 = dma.vmem_to_hbm [thread:$0]  (%p725_p9), %s315_s7, 32, %s317_s8, %s302_s12  }
  0xc1 PF: > { %s328_s19 = sand.u32 1, %s636_s9   ;;  %p452_p0 = pnand %p423_p12, %p732_p11 }
  0xc2   : > { %s329_s3 = scalar_lea.sflag [#allocation4], %s328_s19 }
  0xc3   : > { %p453_p1 = pneg %p452_p0 }
  0xc5   : > { %631 = dma.done.wait (%p453_p1), %s329_s3, 32  }
  0xc6   : > { %633 = vsyncadd (%p453_p1), %s329_s3, 4294967264  ;;  %s21_s14 = sadd.s32 1, %s656_s14   ;;  %s822_s9 = smov %s640_s10 }
  0xc7   : > { %p18_p2 = scmp.ge.s32.totalorder %s21_s14, 4   ;;  %s823_s10 = smov %s644_s11 }
  0xc8   : > { %s824_s11 = smov %s730_s23  ;;  %s825_s12 = smov %s652_s13 }
  0xc9   : > { %s826_s13 = smov %s828_s17  ;;  %20 = sbr.rel (!%p18_p2) target bundleno = 8 (0x8), region = 90 }
  0xce   :  { %335 = vsyncpa [#allocation3], 1 }
  0xcf   :  { %337 = vsyncpa [#allocation3 + $0x1], 1 }
  0xd0   :  { %338 = vsyncpa [#allocation6], 1 }
  0xd1   :  { %340 = vsyncpa [#allocation6 + $0x1], 1 }
  0xd2   :  { %341 = vsyncpa [#allocation4], 1 }
  0xd3   :  { %343 = vsyncpa [#allocation4 + $0x1], 1 }

</bundles_post_ra>
